<compile_context>
chip_gen: v7x
topology: tpu7x:2x2x1
jax: 0.10.0
libtpu: 0.0.40
codegen_flags: <defaults>
</compile_context>

<pallas_src>
import functools

import jax
import jax.numpy as jnp
from jax.experimental import pallas as pl
from jax.experimental.pallas import tpu as pltpu


def _device_kind():
    try:
        return jax.devices()[0].device_kind.lower()
    except Exception:
        return ""


_KIND = _device_kind()
# v5e/v6e have 128 MiB physical VMEM per core -> allow a larger scoped limit;
# v7x has only 64 MiB per TensorCore, so stay at 32 MiB there (and for unknown chips).
_VMEM_LIMIT = (64 if ("v5" in _KIND or "v6" in _KIND) else 32) * 1024 * 1024
# v6e/v7x VALUs are bf16-capable; v5e's VPU is not, so keep the fused BN+ReLU
# prologue math in f32 there (a bf16 prologue would be emulated).
_PRE_DTYPE = jnp.bfloat16 if ("v6" in _KIND or "v7" in _KIND) else jnp.float32

_ROW_BUDGET = 8 * 1024 * 1024   # per-row-tile byte budget (double-buffered by Pallas)


def _row_tile(M, row_bytes, cap=1024):
    """Row-tile size.

    Byte-aware (v7x: 64 MiB VMEM per TC) and guarantees >= 2 grid steps whenever
    M > 8 so the 'parallel' grid axis can shard across v7x's two TensorCores.
    The returned value is a multiple of 8 (sublane) unless it equals M.
    """
    byte_cap = max(8, _ROW_BUDGET // max(int(row_bytes), 1))
    cap = max(8, (min(cap, byte_cap) // 8) * 8)
    if M <= 8:
        return M                          # single full block
    half = ((M + 1) // 2 + 7) // 8 * 8    # 8-aligned ceil(M/2)  -> >= 2 grid steps
    return min(cap, half)


def _bn_fold(bn, eps=1e-5):
    """Eval-mode BatchNorm -> per-channel (scale, shift)."""
    inv = 1.0 / jnp.sqrt(bn["var"] + eps)
    scale = bn["gamma"] * inv
    shift = bn["beta"] - bn["mean"] * scale
    return scale, shift


# --------------------------- fused matmul kernel ----------------------------

def _mm_kernel(*refs, use_pre, use_post, use_bias):
    it = iter(refs)
    a_ref = next(it)
    w_ref = next(it)
    ps_ref = next(it) if use_pre else None
    pb_ref = next(it) if use_pre else None
    qs_ref = next(it) if use_post else None
    qb_ref = next(it) if use_post else None
    bias_ref = next(it) if use_bias else None
    o_ref = next(it)

    a = a_ref[...]
    if use_pre:
        # Fused eval-mode BN + ReLU on the A tile (VPU). bf16 on v6e/v7x, f32 on
        # v5e.  Padded rows of a ragged last block also pass through; their
        # output rows are masked on writeback (benign: nothing reduces across
        # rows below).
        a = jnp.maximum(a.astype(ps_ref.dtype) * ps_ref[...] + pb_ref[...], 0.0)
    acc = jnp.dot(a.astype(jnp.bfloat16), w_ref[...],
                  preferred_element_type=jnp.float32)
    if use_bias:
        acc = acc + bias_ref[...]
    if use_post:
        acc = jnp.maximum(acc * qs_ref[...] + qb_ref[...], 0.0)
    o_ref[...] = acc.astype(o_ref.dtype)


def pallas_matmul(a, w, *, pre=None, post=None, bias=None, out_dtype=jnp.bfloat16):
    """out = [relu(a*pre_s + pre_b)] @ w [+ bias] [then relu(out*post_s + post_b)].

    a: (M, K), w: (K, N).  Grid tiles rows; K and N stay whole.
    """
    M, K = a.shape
    K2, N = w.shape
    assert K == K2
    use_pre, use_post, use_bias = pre is not None, post is not None, bias is not None
    out_dt = jnp.dtype(out_dtype)
    row_bytes = K * a.dtype.itemsize + K * 2 + N * max(out_dt.itemsize, 4)
    tm = _row_tile(M, row_bytes)
    grid = (pl.cdiv(M, tm),)

    args = [a, w.astype(jnp.bfloat16)]
    in_specs = [pl.BlockSpec((tm, K), lambda i: (i, 0)),
                pl.BlockSpec((K, N), lambda i: (0, 0))]
    if use_pre:
        s, b = pre
        args += [s.reshape(1, K).astype(_PRE_DTYPE),
                 b.reshape(1, K).astype(_PRE_DTYPE)]
        in_specs += [pl.BlockSpec((1, K), lambda i: (0, 0))] * 2
    if use_post:
        s, b = post
        args += [s.reshape(1, N).astype(jnp.float32),
                 b.reshape(1, N).astype(jnp.float32)]
        in_specs += [pl.BlockSpec((1, N), lambda i: (0, 0))] * 2
    if use_bias:
        args.append(bias.reshape(1, N).astype(jnp.float32))
        in_specs.append(pl.BlockSpec((1, N), lambda i: (0, 0)))

    kernel = functools.partial(_mm_kernel, use_pre=use_pre, use_post=use_post,
                               use_bias=use_bias)
    return pl.pallas_call(
        kernel,
        out_shape=jax.ShapeDtypeStruct((M, N), out_dt),
        grid=grid,
        in_specs=in_specs,
        out_specs=pl.BlockSpec((tm, N), lambda i: (i, 0)),
        compiler_params=pltpu.CompilerParams(
            dimension_semantics=("parallel",),
            vmem_limit_bytes=_VMEM_LIMIT),
    )(*args)


# ----------------------- direct (halo) 3x3 conv kernel -----------------------

def _conv3x3_kernel(xp_ref, w_ref, o_ref, *, H, W):
    # xp_ref: (1, H+2, W+2, C) activated + zero-padded image (bf16)
    # w_ref : (9, C, G) conv taps (bf16)
    # o_ref : (1, H, W, G)
    # Direct halo convolution: no im2col tensor is materialized in HBM.  Each
    # output spatial row is the f32 accumulation of 9 small MXU matmuls.
    for h in range(H):
        acc = None
        for di in range(3):
            for dj in range(3):
                patch = xp_ref[0, h + di, dj:dj + W, :]            # (W, C)
                part = jnp.dot(patch, w_ref[di * 3 + dj],
                               preferred_element_type=jnp.float32)
                acc = part if acc is None else acc + part
        o_ref[0, h, :, :] = acc.astype(o_ref.dtype)


def pallas_conv3x3(x_pad, w9):
    """3x3 / stride-1 conv on an already zero-padded NHWC input.

    x_pad: (N, H+2, W+2, C) bf16, w9: (9, C, G) -> (N, H, W, G) bf16.
    Grid is over images (>= 2 steps for any real batch -> both v7x cores busy).
    TODO(synk): for large spatial extents, tile output rows with a 1-row halo
    instead of holding the whole padded image per grid step.
    """
    N, Hp, Wp, C = x_pad.shape
    H, W = Hp - 2, Wp - 2
    G = w9.shape[-1]
    kernel = functools.partial(_conv3x3_kernel, H=H, W=W)
    return pl.pallas_call(
        kernel,
        out_shape=jax.ShapeDtypeStruct((N, H, W, G), jnp.bfloat16),
        grid=(N,),
        in_specs=[pl.BlockSpec((1, Hp, Wp, C), lambda n: (n, 0, 0, 0)),
                  pl.BlockSpec((9, C, G), lambda n: (0, 0, 0))],
        out_specs=pl.BlockSpec((1, H, W, G), lambda n: (n, 0, 0, 0)),
        compiler_params=pltpu.CompilerParams(
            dimension_semantics=("parallel",),
            vmem_limit_bytes=_VMEM_LIMIT),
    )(x_pad.astype(jnp.bfloat16), w9.astype(jnp.bfloat16))


# ------------------- fused bn+relu -> pool -> matmul kernel ------------------

def _bnrelu_pool_mm_kernel(*refs, use_bias):
    it = iter(refs)
    x_ref = next(it); s_ref = next(it); b_ref = next(it); w_ref = next(it)
    bias_ref = next(it) if use_bias else None
    o_ref = next(it)

    x = jnp.maximum(x_ref[...].astype(jnp.float32) * s_ref[...] + b_ref[...], 0.0)
    pooled = jnp.mean(x, axis=1)                                  # (tm, C)
    acc = jnp.dot(pooled.astype(jnp.bfloat16), w_ref[...],
                  preferred_element_type=jnp.float32)
    if use_bias:
        acc = acc + bias_ref[...]
    o_ref[...] = acc.astype(o_ref.dtype)


def pallas_bnrelu_pool_matmul(x3, scale, shift, w, bias=None, *,
                              out_dtype=jnp.bfloat16):
    """mean_k relu(x*scale + shift) @ w (+ bias).   x3: (M, Kw, C) -> (M, N)."""
    M, Kw, C = x3.shape
    C2, N = w.shape
    assert C == C2
    use_bias = bias is not None
    out_dt = jnp.dtype(out_dtype)
    row_bytes = Kw * C * 2 + N * max(out_dt.itemsize, 4)
    tm = _row_tile(M, row_bytes)
    grid = (pl.cdiv(M, tm),)

    args = [x3.astype(jnp.bfloat16),
            scale.reshape(1, 1, C).astype(jnp.float32),
            shift.reshape(1, 1, C).astype(jnp.float32),
            w.astype(jnp.bfloat16)]
    in_specs = [pl.BlockSpec((tm, Kw, C), lambda i: (i, 0, 0)),
                pl.BlockSpec((1, 1, C), lambda i: (0, 0, 0)),
                pl.BlockSpec((1, 1, C), lambda i: (0, 0, 0)),
                pl.BlockSpec((C, N), lambda i: (0, 0))]
    if use_bias:
        args.append(bias.reshape(1, N).astype(jnp.float32))
        in_specs.append(pl.BlockSpec((1, N), lambda i: (0, 0)))

    kernel = functools.partial(_bnrelu_pool_mm_kernel, use_bias=use_bias)
    return pl.pallas_call(
        kernel,
        out_shape=jax.ShapeDtypeStruct((M, N), out_dt),
        grid=grid,
        in_specs=in_specs,
        out_specs=pl.BlockSpec((tm, N), lambda i: (i, 0)),
        compiler_params=pltpu.CompilerParams(
            dimension_semantics=("parallel",),
            vmem_limit_bytes=_VMEM_LIMIT),
    )(*args)


# -------------------- fused attention + classifier kernel --------------------

def _attn_cls_kernel(feat_ref, aw_ref, cw_ref, cb_ref, attn_ref, out_ref):
    f = feat_ref[...].astype(jnp.float32)                    # (tb, S, F2)
    # attention score: lane-wise reduce instead of an N=1 MXU matmul.
    # (attn bias adds the same scalar to every score -> softmax-invariant, dropped)
    scores = jnp.sum(f * aw_ref[...], axis=-1)               # (tb, S)
    m = jnp.max(scores, axis=-1, keepdims=True)
    e = jnp.exp(scores - m)
    p = e * pl.reciprocal(jnp.sum(e, axis=-1, keepdims=True), approx=True)
    attn_ref[...] = p
    pooled = jnp.sum(p[..., None] * f, axis=1)               # (tb, F2)
    out_ref[...] = jnp.dot(pooled.astype(jnp.bfloat16), cw_ref[...],
                           preferred_element_type=jnp.float32) + cb_ref[...]


def pallas_attn_head(feat, attn_w, cls_w, cls_b):
    """feat: (B, S, F2) -> (attn (B, S) f32, logits (B, num_classes) f32)."""
    B, S, F2 = feat.shape
    NC = cls_w.shape[1]
    tb = _row_tile(B, S * F2 * 2 + (S + NC) * 4, cap=256)
    grid = (pl.cdiv(B, tb),)
    return pl.pallas_call(
        _attn_cls_kernel,
        out_shape=(jax.ShapeDtypeStruct((B, S), jnp.float32),
                   jax.ShapeDtypeStruct((B, NC), jnp.float32)),
        grid=grid,
        in_specs=[pl.BlockSpec((tb, S, F2), lambda i: (i, 0, 0)),
                  pl.BlockSpec((1, 1, F2), lambda i: (0, 0, 0)),
                  pl.BlockSpec((F2, NC), lambda i: (0, 0)),
                  pl.BlockSpec((1, NC), lambda i: (0, 0))],
        out_specs=(pl.BlockSpec((tb, S), lambda i: (i, 0)),
                   pl.BlockSpec((tb, NC), lambda i: (i, 0))),
        compiler_params=pltpu.CompilerParams(
            dimension_semantics=("parallel",),
            vmem_limit_bytes=_VMEM_LIMIT),
    )(feat.astype(jnp.bfloat16), attn_w.reshape(1, 1, F2).astype(jnp.float32),
      cls_w.astype(jnp.bfloat16), cls_b.reshape(1, NC).astype(jnp.float32))


# ------------------------------- XLA glue ops --------------------------------

def _im2col(x, kh, kw, stride, pad):
    """x: (N,H,W,C) -> bf16 patches (N*Ho*Wo, kh*kw*C), ordering (ki, kj, c)."""
    N, H, W, C = x.shape
    x = x.astype(jnp.bfloat16)
    if pad > 0:
        x = jnp.pad(x, ((0, 0), (pad, pad), (pad, pad), (0, 0)))
    Ho = (H + 2 * pad - kh) // stride + 1
    Wo = (W + 2 * pad - kw) // stride + 1
    cols = [x[:, i:i + stride * Ho:stride, j:j + stride * Wo:stride, :]
            for i in range(kh) for j in range(kw)]
    patches = jnp.stack(cols, axis=3)                        # (N,Ho,Wo,kh*kw,C)
    return patches.reshape(N * Ho * Wo, kh * kw * C), (N, Ho, Wo)


def _conv_weight_2d(w_oihw):
    """PyTorch OIHW conv weight -> (kh*kw*cin, cout) matching _im2col ordering."""
    cout, cin, kh, kw = w_oihw.shape
    return jnp.transpose(w_oihw, (2, 3, 1, 0)).reshape(kh * kw * cin, cout)


def _conv_weight_taps(w_oihw):
    """PyTorch OIHW conv weight -> (kh*kw, cin, cout) taps for the halo-conv kernel."""
    cout, cin, kh, kw = w_oihw.shape
    return jnp.transpose(w_oihw, (2, 3, 1, 0)).reshape(kh * kw, cin, cout)


def maxpool_3x3_s2_p1(x):
    # Per the perf review: lax.reduce_window instead of materializing a 9x window
    # stack in HBM and reading it back with a Pallas max kernel.
    return jax.lax.reduce_window(
        x, jnp.array(-jnp.inf, x.dtype), jax.lax.max,
        window_dimensions=(1, 3, 3, 1), window_strides=(1, 2, 2, 1),
        padding=((0, 0), (1, 1), (1, 1), (0, 0)))


def _window_stack_2x2(x):
    N, H, W, C = x.shape
    Ho, Wo = H // 2, W // 2
    sl = [x[:, i:i + 2 * Ho:2, j:j + 2 * Wo:2, :]
          for i in range(2) for j in range(2)]
    return jnp.stack(sl, axis=3).reshape(N * Ho * Wo, 4, C), (N, Ho, Wo)


# ---------------------------- model forward pass -----------------------------

def dense_layer_forward(p, x):
    """x: running channel concat (N,H,W,Cin) bf16 -> new features (N,H,W,growth)."""
    N, H, W, Cin = x.shape
    s1, b1 = _bn_fold(p["norm1"])
    s2, b2 = _bn_fold(p["norm2"])
    # 1x1 bottleneck: norm1+relu1 prologue, norm2+relu2 epilogue - one pallas_call.
    w1 = _conv_weight_2d(p["conv1_w"])
    h = pallas_matmul(x.reshape(N * H * W, Cin), w1, pre=(s1, b1), post=(s2, b2),
                      out_dtype=jnp.bfloat16)
    Cmid = h.shape[-1]
    # 3x3 conv (pad=1): zero-pad the activated values (as torch does), then a
    # direct halo-conv kernel - no im2col tensor is written to HBM.
    hp = jnp.pad(h.reshape(N, H, W, Cmid), ((0, 0), (1, 1), (1, 1), (0, 0)))
    w2 = _conv_weight_taps(p["conv2_w"])                     # (9, Cmid, growth)
    # drop_rate = 0 -> dropout is the identity
    return pallas_conv3x3(hp, w2)


def transition_forward(p, x):
    # bn+relu -> avgpool(2,2) -> 1x1 conv   ==   bn+relu -> 1x1 conv -> avgpool
    # (bias-free 1x1 conv commutes with spatial averaging) - one fused kernel.
    # TODO(synk): feed the raw NHWC tile instead of the (M,4,C) window stack
    # (needs in-kernel strided spatial slicing); the bf16 stack is one extra
    # copy, not an amplification.
    stacked, (N, Ho, Wo) = _window_stack_2x2(x)
    scale, shift = _bn_fold(p["norm"])
    w = _conv_weight_2d(p["conv_w"])                         # (C, Cout)
    out = pallas_bnrelu_pool_matmul(stacked, scale, shift, w,
                                    out_dtype=jnp.bfloat16)
    return out.reshape(N, Ho, Wo, -1)


def features_forward(params, x_nchw):
    x = jnp.transpose(x_nchw, (0, 2, 3, 1))              # NCHW -> NHWC
    # stem: conv0 (7x7 s2 p3) with norm0+relu0 fused as the matmul epilogue.
    # TODO(synk): the 7x7 im2col still materializes a 49x-amplified (but
    # 3-channel, bf16, once-per-net) patch tensor; a strided halo-conv kernel
    # would remove that round trip too.
    patches, (N, Ho, Wo) = _im2col(x, 7, 7, stride=2, pad=3)
    w0 = _conv_weight_2d(params["conv0_w"])
    s0, b0 = _bn_fold(params["norm0"])
    h = pallas_matmul(patches, w0, post=(s0, b0),
                      out_dtype=jnp.bfloat16).reshape(N, Ho, Wo, -1)
    x = maxpool_3x3_s2_p1(h)
    for block in params["blocks"]:
        # TODO(synk): the running concat still costs O(L^2) HBM copies per block;
        # an aliased in-place channel buffer needs a grouped/transposed feature
        # layout because a growth-wide output block into a wider buffer is not
        # lane-aligned for a blocked out BlockSpec.
        for lp in block["layers"]:
            new = dense_layer_forward(lp, x)
            x = jnp.concatenate([x, new], axis=-1)
        if block["transition"] is not None:
            x = transition_forward(block["transition"], x)
    return x   # norm5 + outer F.relu are fused into the head kernel


def densenet_attn_forward(params, x, use_attention=True):
    """x: (B, S, C, H, W) float32. Returns (logits, attn_weights or None)."""
    B, S, C, H, W = x.shape
    # batch the sequence axis: one pass over B*S frames
    f = features_forward(params, x.reshape(B * S, C, H, W))   # (B*S,Hf,Wf,Cf) bf16
    Nb, Hf, Wf, Cf = f.shape
    s5, b5 = _bn_fold(params["norm5"])
    # head: bn(norm5)+relu -> global avg pool -> fc, fused in one kernel
    feat = pallas_bnrelu_pool_matmul(f.reshape(Nb, Hf * Wf, Cf), s5, b5,
                                     params["fc_w"], params["fc_b"],
                                     out_dtype=jnp.bfloat16)
    F2 = feat.shape[-1]
    feat = feat.reshape(B, S, F2)
    if use_attention:
        attn, logits = pallas_attn_head(feat, params["attn_w"],
                                        params["cls_w"], params["cls_b"])
        return logits, attn.reshape(B, 1, S)
    else:
        pooled = jnp.sum(feat.astype(jnp.float32), axis=1)        # x.sum(1)
        logits = pallas_matmul(pooled, params["cls_w"], bias=params["cls_b"],
                               out_dtype=jnp.float32)
        return logits, None


# -------------------------- deterministic parameters -------------------------

def _make_bn(C):
    return {"gamma": jnp.ones((C,), jnp.float32),
            "beta": jnp.zeros((C,), jnp.float32),
            "mean": jnp.zeros((C,), jnp.float32),
            "var": jnp.ones((C,), jnp.float32)}


def _kaiming_conv(key, cout, cin, kh, kw):
    fan_in = cin * kh * kw
    return jax.random.normal(key, (cout, cin, kh, kw), jnp.float32) * \
        jnp.sqrt(2.0 / fan_in)


def _linear(key, fin, fout):
    # weight stored (in, out); bias forced to 0 by the module's init loop
    w = jax.random.normal(key, (fin, fout), jnp.float32) / jnp.sqrt(float(fin))
    b = jnp.zeros((1, fout), jnp.float32)
    return w, b


def init_params(key, cfg):
    growth, bn_size = cfg["growth_rate"], cfg["bn_size"]
    keys = jax.random.split(key, 64)
    ki = iter(range(64))
    p = {"conv0_w": _kaiming_conv(keys[next(ki)], cfg["num_init_features"],
                                  cfg["num_channels"], 7, 7),
         "norm0": _make_bn(cfg["num_init_features"])}
    nf = cfg["num_init_features"]
    blocks = []
    for bi, num_layers in enumerate(cfg["block_config"]):
        layers = []
        for li in range(num_layers):
            cin = nf + li * growth
            cmid = bn_size * growth
            layers.append({
                "norm1": _make_bn(cin),
                "conv1_w": _kaiming_conv(keys[next(ki)], cmid, cin, 1, 1),
                "norm2": _make_bn(cmid),
                "conv2_w": _kaiming_conv(keys[next(ki)], growth, cmid, 3, 3),
            })
        nf = nf + num_layers * growth
        block = {"layers": layers, "transition": None}
        if bi != len(cfg["block_config"]) - 1:
            block["transition"] = {
                "norm": _make_bn(nf),
                "conv_w": _kaiming_conv(keys[next(ki)], nf // 2, nf, 1, 1),
            }
            nf = nf // 2
        blocks.append(block)
    p["blocks"] = blocks
    p["norm5"] = _make_bn(nf)
    f2 = nf // 2
    p["fc_w"], p["fc_b"] = _linear(keys[next(ki)], nf, f2)
    p["attn_w"], p["attn_b"] = _linear(keys[next(ki)], f2, 1)
    p["cls_w"], p["cls_b"] = _linear(keys[next(ki)], f2, cfg["num_classes"])
    return p


if __name__ == "__main__":
    cfg = dict(growth_rate=8, block_config=(2, 2), num_init_features=16,
               bn_size=2, drop_rate=0.0, use_attention=True,
               num_channels=3, num_classes=10)
    key = jax.random.PRNGKey(0)
    pkey, xkey = jax.random.split(key)
    params = init_params(pkey, cfg)

    B, S, C, H, W = 2, 3, 3, 16, 16
    x = jax.random.normal(xkey, (B, S, C, H, W), jnp.float32)

    logits, attn_weights = densenet_attn_forward(params, x, use_attention=True)
    jax.block_until_ready(logits)
    jax.block_until_ready(attn_weights)

    assert logits.shape == (B, cfg["num_classes"])
    assert attn_weights.shape == (B, 1, S)
    assert bool(jnp.all(jnp.isfinite(logits)))
    assert bool(jnp.all(jnp.isfinite(attn_weights)))
    # softmax attention weights sum to ~1 over the sequence axis (tolerance is
    # loose because the denominator uses the EUP approximate reciprocal and the
    # features are carried in bf16).
    assert bool(jnp.allclose(jnp.sum(attn_weights, axis=-1), 1.0, atol=1e-2))
    print("KERNEL_OK")
</pallas_src>

<mosaic_0001>
module attributes {stable_mosaic.version = 11 : i64} {
  func.func @_mm_kernel(%arg0: i32, %arg1: memref<192x147xbf16, #tpu.memory_space<vmem>>, %arg2: memref<147x16xbf16, #tpu.memory_space<vmem>>, %arg3: memref<1x16xf32, #tpu.memory_space<vmem>>, %arg4: memref<1x16xf32, #tpu.memory_space<vmem>>, %arg5: memref<192x16xbf16, #tpu.memory_space<vmem>>) attributes {dimension_semantics = [#tpu.dimension_semantics<parallel>], iteration_bounds = array<i64: 2>, scalar_prefetch = 0 : i64, scratch_operands = 0 : i64, tpu.core_type = #tpu.core_type<tc>, window_params = [{transform_indices = @transform_0, window_bounds = array<i64: 192, 147>}, {pipeline_mode = #tpu.pipeline_mode<synchronous>, transform_indices = @transform_1, window_bounds = array<i64: 147, 16>}, {pipeline_mode = #tpu.pipeline_mode<synchronous>, transform_indices = @transform_2, window_bounds = array<i64: 1, 16>}, {pipeline_mode = #tpu.pipeline_mode<synchronous>, transform_indices = @transform_3, window_bounds = array<i64: 1, 16>}, {transform_indices = @transform_4, window_bounds = array<i64: 192, 16>}]} {
    %c0 = arith.constant 0 : index
    %c0_0 = arith.constant 0 : index
    %0 = vector.load %arg1[%c0, %c0_0] : memref<192x147xbf16, #tpu.memory_space<vmem>>, vector<192x147xbf16>
    %c0_1 = arith.constant 0 : index
    %c0_2 = arith.constant 0 : index
    %1 = vector.load %arg2[%c0_1, %c0_2] : memref<147x16xbf16, #tpu.memory_space<vmem>>, vector<147x16xbf16>
    %cst = arith.constant dense<0.000000e+00> : vector<192x16xf32>
    %2 = tpu.matmul %0, %1, %cst {dimension_numbers = #tpu.dot_dimension_numbers<[1], [0], [0], [1], [0, 0, 1, 1], [], []>} : vector<192x147xbf16>, vector<147x16xbf16>, vector<192x16xf32> -> vector<192x16xf32>
    %c0_3 = arith.constant 0 : index
    %c0_4 = arith.constant 0 : index
    %3 = vector.load %arg3[%c0_3, %c0_4] : memref<1x16xf32, #tpu.memory_space<vmem>>, vector<1x16xf32>
    %4 = vector.broadcast %3 : vector<1x16xf32> to vector<192x16xf32>
    %5 = arith.mulf %2, %4 : vector<192x16xf32>
    %c0_5 = arith.constant 0 : index
    %c0_6 = arith.constant 0 : index
    %6 = vector.load %arg4[%c0_5, %c0_6] : memref<1x16xf32, #tpu.memory_space<vmem>>, vector<1x16xf32>
    %7 = vector.broadcast %6 : vector<1x16xf32> to vector<192x16xf32>
    %8 = arith.addf %5, %7 : vector<192x16xf32>
    %cst_7 = arith.constant 0.000000e+00 : f32
    %9 = vector.broadcast %cst_7 : f32 to vector<192x16xf32>
    %10 = arith.maximumf %8, %9 : vector<192x16xf32>
    %11 = arith.truncf %10 : vector<192x16xf32> to vector<192x16xbf16>
    %c0_8 = arith.constant 0 : index
    %c0_9 = arith.constant 0 : index
    %12 = vector.load %arg5[%c0_8, %c0_9] : memref<192x16xbf16, #tpu.memory_space<vmem>>, vector<192x16xbf16>
    tpu.vector_store %arg5[%c0_8, %c0_9], %11 {strides = array<i32>} : memref<192x16xbf16, #tpu.memory_space<vmem>>, vector<192x16xbf16>,
    return
  }
  func.func @transform_0(%arg0: i32) -> (i32, i32) {
    %c0_i32 = arith.constant 0 : i32
    %c0_i32_0 = arith.constant 0 : i32
    return %arg0, %c0_i32 : i32, i32
  }
  func.func @transform_1(%arg0: i32) -> (i32, i32) {
    %c0_i32 = arith.constant 0 : i32
    %c0_i32_0 = arith.constant 0 : i32
    %c0_i32_1 = arith.constant 0 : i32
    return %c0_i32, %c0_i32_0 : i32, i32
  }
  func.func @transform_2(%arg0: i32) -> (i32, i32) {
    %c0_i32 = arith.constant 0 : i32
    %c0_i32_0 = arith.constant 0 : i32
    %c0_i32_1 = arith.constant 0 : i32
    return %c0_i32, %c0_i32_0 : i32, i32
  }
  func.func @transform_3(%arg0: i32) -> (i32, i32) {
    %c0_i32 = arith.constant 0 : i32
    %c0_i32_0 = arith.constant 0 : i32
    %c0_i32_1 = arith.constant 0 : i32
    return %c0_i32, %c0_i32_0 : i32, i32
  }
  func.func @transform_4(%arg0: i32) -> (i32, i32) {
    %c0_i32 = arith.constant 0 : i32
    %c0_i32_0 = arith.constant 0 : i32
    return %arg0, %c0_i32 : i32, i32
  }
}

</mosaic_0001>

<bundles_post_ra>
// kernel: tpu_custom_call.1
= control target key start
LH: loop header
LB: loop body
LE: loop exit
PB: predicated region body
PF: predicated region fallthrough
CT: control target
= control target key end

     0   :  { %s1067_s15 = smov 0   ;;  %s1264_s0 = inlined_call_operand.vmem [shape: bf16[384,147], index: 0, kind: input, shape index: {}]   ;;  %s1265_s1 = inlined_call_operand.vmem [shape: bf16[147,16], index: 1, kind: input, shape index: {}]   ;;  %s1266_s2 = inlined_call_operand.vmem [shape: f32[1,16], index: 2, kind: input, shape index: {}]   ;;  %s1267_s3 = inlined_call_operand.vmem [shape: f32[1,16], index: 3, kind: input, shape index: {}]   ;;  %s1268_s4 = inlined_call_operand.vmem [shape: bf16[384,16], index: 4, kind: output, shape index: {}]  }
   0x1 LB: > { %s849_s16 = sadd.s32 4294967295, %s1038_s15   ;;  %p853_p0 = scmp.ge.s32.totalorder %s1038_s15, 1  ;;  %s1038_s15 = sphi %s1067_s15, %s14_s15  }
   0x2   : > { %p164_p1 = scmp.lt.s32.totalorder %s1038_s15, 3 }
   0x4   : > { %p165_p2 = pnand %p853_p0, %p164_p1 }
   0x5   : > { %v986_v0 = vld [vmem:[%s1265_s1] sm:$0xff] (!%p165_p2)   ;;  %v1040_v1 = vmov (!%p165_p2), 0   ;;  %v987_v2 = vld [vmem:[%s1265_s1 + $0x8] sm:$0xff] (!%p165_p2)   ;;  %v988_v3 = vld [vmem:[%s1265_s1 + $0x10] sm:$0xff] (!%p165_p2)   ;;  %s191_s23 = smul.u32 (!%p165_p2), 24, %s849_s16  ;;  %vm413_vm0 = vcmask (!%p165_p2), 154624  }
   0x6   : > { %168 = sbr.rel (%p165_p2) target bundleno = 310 (0x136), region = 36  ;;  %457 = vmatprep.subr.bf16.mxu0 (!%p165_p2), %v1040_v1  ;;  %956 = vmatprep.subr.bf16.mxu1 (!%p165_p2), %v1040_v1  ;;  %v989_v4 = vld [vmem:[%s1265_s1 + $0x18] sm:$0xff] (!%p165_p2)   ;;  %v990_v5 = vld [vmem:[%s1265_s1 + $0x20] sm:$0xff] (!%p165_p2)   ;;  %v991_v8 = vld [vmem:[%s1265_s1 + $0x28] sm:$0xff] (!%p165_p2)   ;;  %vm450_vm1 = vcmask (!%p165_p2), 1040384   ;;  %vm451_vm2 = vcmask (!%p165_p2), 1041408  }
   0x7   : > { %458 = vmatpush1.bf16.msra.mxu0 (!%p165_p2), %v986_v0  ;;  %966 = vmatpush1.bf16.msra.mxu1 (!%p165_p2), %v986_v0  ;;  %p192_p3 = scmp.lt.s32.totalorder (!%p165_p2), %s191_s23, 47  ;;  %v992_v9 = vld [vmem:[%s1265_s1 + $0x30] sm:$0xff] (!%p165_p2)   ;;  %v993_v10 = vld [vmem:[%s1265_s1 + $0x38] sm:$0xff] (!%p165_p2)   ;;  %v1041_v11 = vmov (!%p165_p2), 65535   ;;  %v994_v13 = vld [vmem:[%s1265_s1 + $0x40] sm:$0xff] (!%p165_p2)   ;;  %vm768_vm3 = vcmask (!%p165_p2), 125952  }
   0x8   : > { %459 = vmatprep.subr.bf16.mxu0 (!%p165_p2), %v1040_v1  ;;  %957 = vmatprep.subr.bf16.mxu1 (!%p165_p2), %v1040_v1  ;;  %v452_v12 = vsel (!%p165_p2), %vm450_vm1, 4294967295, %v1041_v11  ;;  %v995_v14 = vld [vmem:[%s1265_s1 + $0x48] ss:$0 sps:$4 sm:$0x33] (!%p165_p2)   ;;  %v1152_v39 = vld [vmem:[%s1266_s2] ss:$0 sm:$0xff] (!%p165_p2) }
   0x9   : > { %v453_v15 = vsel (!%p165_p2), %vm451_vm2, %v452_v12, 0  ;;  %v1157_v41 = vld [vmem:[%s1267_s3] ss:$0 sm:$0xff] (!%p165_p2) }
   0xa   : > { %v455_v16 = vand.u32 (!%p165_p2), %v995_v14, %v453_v15 }
   0xb   : > { %460 = vmatpush1.bf16.msra.mxu0 (!%p165_p2), %v987_v2  ;;  %967 = vmatpush1.bf16.msra.mxu1 (!%p165_p2), %v987_v2 }
   0xc   : > { %461 = vmatprep.subr.bf16.mxu0 (!%p165_p2), %v1040_v1  ;;  %958 = vmatprep.subr.bf16.mxu1 (!%p165_p2), %v1040_v1 }
   0xd   : > { %s1270_s23 = smov (!%p192_p3, %s191_s23), 47 }
   0xe   : > { %s931_s26 = sshll.u32 %s1270_s23, 3  ;;  %s856_s21 = sshll.u32 %s1270_s23, 2 }
   0xf   : > { %462 = vmatpush1.bf16.msra.mxu0 %v988_v3  ;;  %968 = vmatpush1.bf16.msra.mxu1 %v988_v3  ;;  %s1093_s29 = scalar_lea.vmem %s1264_s0, %s931_s26  ;;  %s1171_s23 = scalar_lea.vmem %s1268_s4, %s856_s21 }
  0x10   : > { %463 = vmatprep.subr.bf16.mxu0 %v1040_v1  ;;  %959 = vmatprep.subr.bf16.mxu1 %v1040_v1  ;;  %v998_v6 = vld [vmem:[%s1093_s29 + $0x4] ss:$8 sps:$4 sm:$0xff]   ;;  %v996_v17 = vld [vmem:[%s1093_s29] ss:$8 sps:$4 sm:$0xff]   ;;  %v1002_v19 = vld [vmem:[%s1093_s29 + $0x14] ss:$8 sps:$4 sm:$0xff]  }
  0x11   : > { %v1001_v7 = vld [vmem:[%s1093_s29 + $0x64] ss:$8 sps:$4 sm:$0xff]   ;;  %891 = vmatprep.mubr.msk.bf16.mxu0 %vm413_vm0, %v998_v6  ;;  %v999_v18 = vld [vmem:[%s1093_s29 + $0x60] ss:$8 sps:$4 sm:$0xff]   ;;  %v1004_v20 = vld [vmem:[%s1093_s29 + $0x74] ss:$8 sps:$4 sm:$0xff]  }
  0x12   : > { %897 = vmatprep.mubr.msk.bf16.mxu1 %vm413_vm0, %v1001_v7  ;;  %v1006_v21 = vld [vmem:[%s1093_s29 + $0x10] ss:$8 sps:$4 sm:$0xff]   ;;  %v1008_v23 = vld [vmem:[%s1093_s29 + $0x24] ss:$8 sps:$4 sm:$0xff]   ;;  %v1012_v25 = vld [vmem:[%s1093_s29 + $0x20] ss:$8 sps:$4 sm:$0xff]  }
  0x13   : > { %464 = vmatpush1.bf16.msra.mxu0 %v989_v4  ;;  %969 = vmatpush1.bf16.msra.mxu1 %v989_v4  ;;  %v1007_v22 = vld [vmem:[%s1093_s29 + $0x70] ss:$8 sps:$4 sm:$0xff]   ;;  %v1010_v24 = vld [vmem:[%s1093_s29 + $0x84] ss:$8 sps:$4 sm:$0xff]   ;;  %v1013_v26 = vld [vmem:[%s1093_s29 + $0x80] ss:$8 sps:$4 sm:$0xff]  }
  0x14   : > { %465 = vmatprep.subr.bf16.mxu0 %v1040_v1  ;;  %960 = vmatprep.subr.bf16.mxu1 %v1040_v1  ;;  %v1014_v27 = vld [vmem:[%s1093_s29 + $0x34] ss:$8 sps:$4 sm:$0xff]   ;;  %v1018_v29 = vld [vmem:[%s1093_s29 + $0x30] ss:$8 sps:$4 sm:$0xff]   ;;  %v1020_v31 = vld [vmem:[%s1093_s29 + $0x44] ss:$8 sps:$4 sm:$0xff]  }
  0x15   : > { %v1016_v28 = vld [vmem:[%s1093_s29 + $0x94] ss:$8 sps:$4 sm:$0xff]   ;;  %v1019_v30 = vld [vmem:[%s1093_s29 + $0x90] ss:$8 sps:$4 sm:$0xff]   ;;  %v1022_v32 = vld [vmem:[%s1093_s29 + $0xa4] ss:$8 sps:$4 sm:$0xff]  }
  0x16   : > { %v1024_v33 = vld [vmem:[%s1093_s29 + $0x40] ss:$8 sps:$4 sm:$0xff]   ;;  %v1026_v35 = vld [vmem:[%s1093_s29 + $0x54] ss:$8 sps:$4 sm:$0xff]   ;;  %v1030_v37 = vld [vmem:[%s1093_s29 + $0x50] ss:$8 sps:$4 sm:$0xff]  }
  0x17   : > { %466 = vmatpush1.bf16.msra.mxu0 %v990_v5  ;;  %970 = vmatpush1.bf16.msra.mxu1 %v990_v5  ;;  %v1025_v34 = vld [vmem:[%s1093_s29 + $0xa0] ss:$8 sps:$4 sm:$0xff]   ;;  %v1028_v36 = vld [vmem:[%s1093_s29 + $0xb4] ss:$8 sps:$4 sm:$0xff]   ;;  %v1031_v38 = vld [vmem:[%s1093_s29 + $0xb0] ss:$8 sps:$4 sm:$0xff]  }
  0x18   : > { %467 = vmatprep.subr.bf16.mxu0 %v1040_v1  ;;  %961 = vmatprep.subr.bf16.mxu1 %v1040_v1 }
  0x1b   : > { %468 = vmatpush1.bf16.msra.mxu0 %v991_v8  ;;  %971 = vmatpush1.bf16.msra.mxu1 %v991_v8 }
  0x1c   : > { %469 = vmatprep.subr.bf16.mxu0 %v1040_v1  ;;  %962 = vmatprep.subr.bf16.mxu1 %v1040_v1 }
  0x1f   : > { %470 = vmatpush1.bf16.msra.mxu0 %v992_v9  ;;  %972 = vmatpush1.bf16.msra.mxu1 %v992_v9 }
  0x20   : > { %471 = vmatprep.subr.bf16.mxu0 %v1040_v1  ;;  %963 = vmatprep.subr.bf16.mxu1 %v1040_v1 }
  0x23   : > { %472 = vmatpush1.bf16.msra.mxu0 %v993_v10  ;;  %973 = vmatpush1.bf16.msra.mxu1 %v993_v10 }
  0x24   : > { %473 = vmatprep.subr.bf16.mxu0 %v1040_v1  ;;  %964 = vmatprep.subr.bf16.mxu1 %v1040_v1 }
  0x27   : > { %474 = vmatpush1.bf16.msra.mxu0 %v994_v13  ;;  %974 = vmatpush1.bf16.msra.mxu1 %v994_v13 }
  0x28   : > { %475 = vmatprep.subr.bf16.mxu0 %v1040_v1  ;;  %965 = vmatprep.subr.bf16.mxu1 %v1040_v1 }
  0x2b   : > { %476 = vmatpush1.bf16.msra.mxu0 %v455_v16  ;;  %975 = vmatpush1.bf16.msra.mxu1 %v455_v16 }
  0x2e   : > { %490 = vmatmul.mubr.bf16.vlgmr.msra.gmra.mrb[0].mxu0 %v996_v17  ;;  %538 = vmatmul.mubr.bf16.vlgmr.msra.gmra.mrb[0].mxu1 %v999_v18 }
  0x2f   : > { %892 = vmatprep.mubr.msk.bf16.mxu0 %vm413_vm0, %v1002_v19  ;;  %898 = vmatprep.mubr.msk.bf16.mxu1 %vm413_vm0, %v1004_v20 }
  0x36   : > { %498 = vmatmul.mubr.bf16.gmra.mrb[4].mxu0 %v1006_v21  ;;  %546 = vmatmul.mubr.bf16.gmra.mrb[4].mxu1 %v1007_v22 }
  0x37   : > { %893 = vmatprep.mubr.msk.bf16.mxu0 %vm413_vm0, %v1008_v23  ;;  %899 = vmatprep.mubr.msk.bf16.mxu1 %vm413_vm0, %v1010_v24 }
  0x3e   : > { %506 = vmatmul.mubr.bf16.gmra.mrb[8].mxu0 %v1012_v25  ;;  %554 = vmatmul.mubr.bf16.gmra.mrb[8].mxu1 %v1013_v26 }
  0x3f   : > { %894 = vmatprep.mubr.msk.bf16.mxu0 %vm413_vm0, %v1014_v27  ;;  %900 = vmatprep.mubr.msk.bf16.mxu1 %vm413_vm0, %v1016_v28 }
  0x46   : > { %514 = vmatmul.mubr.bf16.gmra.mrb[12].mxu0 %v1018_v29  ;;  %562 = vmatmul.mubr.bf16.gmra.mrb[12].mxu1 %v1019_v30 }
  0x47   : > { %895 = vmatprep.mubr.msk.bf16.mxu0 %vm413_vm0, %v1020_v31  ;;  %901 = vmatprep.mubr.msk.bf16.mxu1 %vm413_vm0, %v1022_v32 }
  0x4e   : > { %522 = vmatmul.mubr.bf16.gmra.mrb[16].mxu0 %v1024_v33  ;;  %570 = vmatmul.mubr.bf16.gmra.mrb[16].mxu1 %v1025_v34 }
  0x4f   : > { %896 = vmatprep.mubr.msk.bf16.mxu0 %vm413_vm0, %v1026_v35  ;;  %902 = vmatprep.mubr.msk.bf16.mxu1 %vm413_vm0, %v1028_v36 }
  0x56   : > { %530 = vmatmul.mubr.bf16.gmra.mrb[20].mxu0 %v1030_v37  ;;  %578 = vmatmul.mubr.bf16.gmra.mrb[20].mxu1 %v1031_v38 }
 0x101   : > { %v491_v40 = vpop.f32.mrb[0].mxu0  ;;  %v539_v42 = vpop.f32.mrb[0].mxu1 }
 0x102   : > { %v593_v43 = vmul.f32 %v1152_v39, %v491_v40  ;;  %v605_v44 = vmul.f32 %v1152_v39, %v539_v42  ;;  %v493_v45 = vpop.f32.mrb[1].mxu0  ;;  %v541_v46 = vpop.f32.mrb[1].mxu1 }
 0x103   : > { %v494_v47 = vpop.f32.mrb[2].mxu0  ;;  %v542_v48 = vpop.f32.mrb[2].mxu1 }
 0x104   : > { %v624_v49 = vadd.f32 %v1157_v41, %v593_v43  ;;  %v636_v50 = vadd.f32 %v1157_v41, %v605_v44  ;;  %v594_v51 = vmul.f32 %v1152_v39, %v494_v47  ;;  %v606_v52 = vmul.f32 %v1152_v39, %v542_v48  ;;  %v496_v53 = vpop.f32.mrb[3].mxu0  ;;  %v544_v54 = vpop.f32.mrb[3].mxu1 }
 0x106   : > { %v648_v55 = vmax.f32 %v624_v49, 0.0  ;;  %v660_v56 = vmax.f32 %v636_v50, 0.0  ;;  %v625_v57 = vadd.f32 %v1157_v41, %v594_v51  ;;  %v637_v58 = vadd.f32 %v1157_v41, %v606_v52 }
 0x108   : > { %v932_v59 = vpack.c.bf16 %v648_v55, %v648_v55  ;;  %v944_v60 = vpack.c.bf16 %v660_v56, %v660_v56  ;;  %v649_v61 = vmax.f32 %v625_v57, 0.0  ;;  %v661_v62 = vmax.f32 %v637_v58, 0.0 }
 0x109   : > { %v499_v63 = vpop.f32.mrb[4].mxu0  ;;  %v547_v0 = vpop.f32.mrb[4].mxu1 }
 0x10a   : > { %769 = vst.msk [vmem:[%s1171_s23] sm:$0xf] %vm768_vm3, %v932_v59  ;;  %781 = vst.msk [vmem:[%s1171_s23 + $0x30] sm:$0xf] %vm768_vm3, %v944_v60  ;;  %v933_v1 = vpack.c.bf16 %v649_v61, %v649_v61  ;;  %v945_v2 = vpack.c.bf16 %v661_v62, %v661_v62  ;;  %v595_v3 = vmul.f32 %v1152_v39, %v499_v63  ;;  %v501_v5 = vpop.f32.mrb[5].mxu0  ;;  %v549_v6 = vpop.f32.mrb[5].mxu1 }
 0x10b   : > { %v607_v4 = vmul.f32 %v1152_v39, %v547_v0  ;;  %v502_v7 = vpop.f32.mrb[6].mxu0  ;;  %v550_v8 = vpop.f32.mrb[6].mxu1 }
 0x10c   : > { %770 = vst.msk [vmem:[%s1171_s23 + $0x4] sm:$0xf] %vm768_vm3, %v933_v1  ;;  %782 = vst.msk [vmem:[%s1171_s23 + $0x34] sm:$0xf] %vm768_vm3, %v945_v2  ;;  %v626_v9 = vadd.f32 %v1157_v41, %v595_v3  ;;  %v596_v11 = vmul.f32 %v1152_v39, %v502_v7  ;;  %v608_v12 = vmul.f32 %v1152_v39, %v550_v8  ;;  %v504_v13 = vpop.f32.mrb[7].mxu0  ;;  %v552_v14 = vpop.f32.mrb[7].mxu1 }
 0x10d   : > { %v638_v10 = vadd.f32 %v1157_v41, %v607_v4 }
 0x10e   : > { %v650_v15 = vmax.f32 %v626_v9, 0.0  ;;  %v627_v17 = vadd.f32 %v1157_v41, %v596_v11  ;;  %v639_v18 = vadd.f32 %v1157_v41, %v608_v12 }
 0x10f   : > { %v662_v16 = vmax.f32 %v638_v10, 0.0 }
 0x110   : > { %v934_v19 = vpack.c.bf16 %v650_v15, %v650_v15  ;;  %v651_v21 = vmax.f32 %v627_v17, 0.0  ;;  %v663_v22 = vmax.f32 %v639_v18, 0.0 }
 0x111   : > { %v946_v20 = vpack.c.bf16 %v662_v16, %v662_v16  ;;  %v507_v23 = vpop.f32.mrb[8].mxu0  ;;  %v555_v24 = vpop.f32.mrb[8].mxu1 }
 0x112   : > { %771 = vst.msk [vmem:[%s1171_s23 + $0x8] sm:$0xf] %vm768_vm3, %v934_v19  ;;  %v935_v25 = vpack.c.bf16 %v651_v21, %v651_v21  ;;  %v947_v26 = vpack.c.bf16 %v663_v22, %v663_v22  ;;  %v597_v27 = vmul.f32 %v1152_v39, %v507_v23  ;;  %v609_v28 = vmul.f32 %v1152_v39, %v555_v24  ;;  %v509_v29 = vpop.f32.mrb[9].mxu0  ;;  %v557_v30 = vpop.f32.mrb[9].mxu1 }
 0x113   : > { %783 = vst.msk [vmem:[%s1171_s23 + $0x38] sm:$0xf] %vm768_vm3, %v946_v20  ;;  %v510_v31 = vpop.f32.mrb[10].mxu0  ;;  %v558_v32 = vpop.f32.mrb[10].mxu1 }
 0x114   : > { %772 = vst.msk [vmem:[%s1171_s23 + $0xc] sm:$0xf] %vm768_vm3, %v935_v25  ;;  %784 = vst.msk [vmem:[%s1171_s23 + $0x3c] sm:$0xf] %vm768_vm3, %v947_v26  ;;  %v628_v33 = vadd.f32 %v1157_v41, %v597_v27  ;;  %v640_v34 = vadd.f32 %v1157_v41, %v609_v28  ;;  %v598_v35 = vmul.f32 %v1152_v39, %v510_v31  ;;  %v512_v37 = vpop.f32.mrb[11].mxu0  ;;  %v560_v38 = vpop.f32.mrb[11].mxu1 }
 0x115   : > { %v610_v36 = vmul.f32 %v1152_v39, %v558_v32 }
 0x116   : > { %v652_v40 = vmax.f32 %v628_v33, 0.0  ;;  %v664_v42 = vmax.f32 %v640_v34, 0.0  ;;  %v629_v43 = vadd.f32 %v1157_v41, %v598_v35 }
 0x117   : > { %v641_v44 = vadd.f32 %v1157_v41, %v610_v36 }
 0x118   : > { %v936_v45 = vpack.c.bf16 %v652_v40, %v652_v40  ;;  %v948_v46 = vpack.c.bf16 %v664_v42, %v664_v42  ;;  %v653_v47 = vmax.f32 %v629_v43, 0.0 }
 0x119   : > { %v665_v48 = vmax.f32 %v641_v44, 0.0  ;;  %v515_v49 = vpop.f32.mrb[12].mxu0  ;;  %v563_v50 = vpop.f32.mrb[12].mxu1 }
 0x11a   : > { %773 = vst.msk [vmem:[%s1171_s23 + $0x10] sm:$0xf] %vm768_vm3, %v936_v45  ;;  %785 = vst.msk [vmem:[%s1171_s23 + $0x40] sm:$0xf] %vm768_vm3, %v948_v46  ;;  %v937_v51 = vpack.c.bf16 %v653_v47, %v653_v47  ;;  %v599_v53 = vmul.f32 %v1152_v39, %v515_v49  ;;  %v611_v54 = vmul.f32 %v1152_v39, %v563_v50  ;;  %v517_v55 = vpop.f32.mrb[13].mxu0  ;;  %v565_v56 = vpop.f32.mrb[13].mxu1 }
 0x11b   : > { %v949_v52 = vpack.c.bf16 %v665_v48, %v665_v48  ;;  %v518_v57 = vpop.f32.mrb[14].mxu0  ;;  %v566_v58 = vpop.f32.mrb[14].mxu1 }
 0x11c   : > { %774 = vst.msk [vmem:[%s1171_s23 + $0x14] sm:$0xf] %vm768_vm3, %v937_v51  ;;  %v630_v59 = vadd.f32 %v1157_v41, %v599_v53  ;;  %v642_v60 = vadd.f32 %v1157_v41, %v611_v54  ;;  %v600_v61 = vmul.f32 %v1152_v39, %v518_v57  ;;  %v612_v62 = vmul.f32 %v1152_v39, %v566_v58  ;;  %v520_v63 = vpop.f32.mrb[15].mxu0  ;;  %v568_v0 = vpop.f32.mrb[15].mxu1 }
 0x11d   : > { %786 = vst.msk [vmem:[%s1171_s23 + $0x44] sm:$0xf] %vm768_vm3, %v949_v52 }
 0x11e   : > { %v654_v1 = vmax.f32 %v630_v59, 0.0  ;;  %v666_v2 = vmax.f32 %v642_v60, 0.0  ;;  %v631_v3 = vadd.f32 %v1157_v41, %v600_v61  ;;  %v643_v4 = vadd.f32 %v1157_v41, %v612_v62 }
 0x120   : > { %v938_v5 = vpack.c.bf16 %v654_v1, %v654_v1  ;;  %v950_v6 = vpack.c.bf16 %v666_v2, %v666_v2  ;;  %v655_v7 = vmax.f32 %v631_v3, 0.0  ;;  %v667_v8 = vmax.f32 %v643_v4, 0.0 }
 0x121   : > { %v523_v9 = vpop.f32.mrb[16].mxu0  ;;  %v571_v10 = vpop.f32.mrb[16].mxu1 }
 0x122   : > { %775 = vst.msk [vmem:[%s1171_s23 + $0x18] sm:$0xf] %vm768_vm3, %v938_v5  ;;  %787 = vst.msk [vmem:[%s1171_s23 + $0x48] sm:$0xf] %vm768_vm3, %v950_v6  ;;  %v939_v11 = vpack.c.bf16 %v655_v7, %v655_v7  ;;  %v951_v12 = vpack.c.bf16 %v667_v8, %v667_v8  ;;  %v601_v13 = vmul.f32 %v1152_v39, %v523_v9  ;;  %v525_v15 = vpop.f32.mrb[17].mxu0  ;;  %v573_v16 = vpop.f32.mrb[17].mxu1 }
 0x123   : > { %v613_v14 = vmul.f32 %v1152_v39, %v571_v10  ;;  %v526_v17 = vpop.f32.mrb[18].mxu0  ;;  %v574_v18 = vpop.f32.mrb[18].mxu1 }
 0x124   : > { %776 = vst.msk [vmem:[%s1171_s23 + $0x1c] sm:$0xf] %vm768_vm3, %v939_v11  ;;  %788 = vst.msk [vmem:[%s1171_s23 + $0x4c] sm:$0xf] %vm768_vm3, %v951_v12  ;;  %v632_v19 = vadd.f32 %v1157_v41, %v601_v13  ;;  %v602_v21 = vmul.f32 %v1152_v39, %v526_v17  ;;  %v614_v22 = vmul.f32 %v1152_v39, %v574_v18  ;;  %v528_v23 = vpop.f32.mrb[19].mxu0  ;;  %v576_v24 = vpop.f32.mrb[19].mxu1 }
 0x125   : > { %v644_v20 = vadd.f32 %v1157_v41, %v613_v14 }
 0x126   : > { %v656_v25 = vmax.f32 %v632_v19, 0.0  ;;  %v633_v27 = vadd.f32 %v1157_v41, %v602_v21  ;;  %v645_v28 = vadd.f32 %v1157_v41, %v614_v22 }
 0x127   : > { %v668_v26 = vmax.f32 %v644_v20, 0.0 }
 0x128   : > { %v940_v29 = vpack.c.bf16 %v656_v25, %v656_v25  ;;  %v657_v31 = vmax.f32 %v633_v27, 0.0  ;;  %v669_v32 = vmax.f32 %v645_v28, 0.0 }
 0x129   : > { %v952_v30 = vpack.c.bf16 %v668_v26, %v668_v26  ;;  %v531_v33 = vpop.f32.mrb[20].mxu0  ;;  %v579_v34 = vpop.f32.mrb[20].mxu1 }
 0x12a   : > { %777 = vst.msk [vmem:[%s1171_s23 + $0x20] sm:$0xf] %vm768_vm3, %v940_v29  ;;  %v941_v35 = vpack.c.bf16 %v657_v31, %v657_v31  ;;  %v953_v36 = vpack.c.bf16 %v669_v32, %v669_v32  ;;  %v603_v37 = vmul.f32 %v1152_v39, %v531_v33  ;;  %v615_v38 = vmul.f32 %v1152_v39, %v579_v34  ;;  %v533_v40 = vpop.f32.mrb[21].mxu0  ;;  %v581_v42 = vpop.f32.mrb[21].mxu1 }
 0x12b   : > { %789 = vst.msk [vmem:[%s1171_s23 + $0x50] sm:$0xf] %vm768_vm3, %v952_v30  ;;  %v534_v43 = vpop.f32.mrb[22].mxu0  ;;  %v582_v44 = vpop.f32.mrb[22].mxu1 }
 0x12c   : > { %778 = vst.msk [vmem:[%s1171_s23 + $0x24] sm:$0xf] %vm768_vm3, %v941_v35  ;;  %790 = vst.msk [vmem:[%s1171_s23 + $0x54] sm:$0xf] %vm768_vm3, %v953_v36  ;;  %v634_v45 = vadd.f32 %v1157_v41, %v603_v37  ;;  %v646_v46 = vadd.f32 %v1157_v41, %v615_v38  ;;  %v604_v47 = vmul.f32 %v1152_v39, %v534_v43  ;;  %v536_v49 = vpop.f32.mrb[23].mxu0  ;;  %v584_v50 = vpop.f32.mrb[23].mxu1 }
 0x12d   : > { %v616_v48 = vmul.f32 %v1152_v39, %v582_v44 }
 0x12e   : > { %v658_v51 = vmax.f32 %v634_v45, 0.0  ;;  %v670_v52 = vmax.f32 %v646_v46, 0.0  ;;  %v635_v53 = vadd.f32 %v1157_v41, %v604_v47 }
 0x12f   : > { %v647_v54 = vadd.f32 %v1157_v41, %v616_v48 }
 0x130   : > { %v942_v55 = vpack.c.bf16 %v658_v51, %v658_v51  ;;  %v954_v56 = vpack.c.bf16 %v670_v52, %v670_v52  ;;  %v659_v57 = vmax.f32 %v635_v53, 0.0 }
 0x131   : > { %v671_v58 = vmax.f32 %v647_v54, 0.0 }
 0x132   : > { %779 = vst.msk [vmem:[%s1171_s23 + $0x28] sm:$0xf] %vm768_vm3, %v942_v55  ;;  %791 = vst.msk [vmem:[%s1171_s23 + $0x58] sm:$0xf] %vm768_vm3, %v954_v56  ;;  %v943_v59 = vpack.c.bf16 %v659_v57, %v659_v57 }
 0x133   : > { %v955_v60 = vpack.c.bf16 %v671_v58, %v671_v58 }
 0x134   : > { %780 = vst.msk [vmem:[%s1171_s23 + $0x2c] sm:$0xf] %vm768_vm3, %v943_v59 }
 0x135   : > { %792 = vst.msk [vmem:[%s1171_s23 + $0x5c] sm:$0xf] %vm768_vm3, %v955_v60 }
 0x136 PF: > { %s14_s15 = sadd.s32 1, %s1038_s15  }
 0x137   : > { %p11_p4 = scmp.ge.s32.totalorder %s14_s15, 4  }
 0x139   :  { %13 = sbr.rel (!%p11_p4) target bundleno = 1 (0x1), region = 66 }

</bundles_post_ra>
